<compile_context>
chip_gen: v7x
topology: tpu7x:2x2x1
jax: 0.10.0
libtpu: 0.0.40
codegen_flags: <defaults>
</compile_context>

<pallas_src>
import jax
import jax.numpy as jnp
from jax.experimental import pallas as pl
from jax.experimental.pallas import tpu as pltpu

_TARGET_BYTES = 8 * 1024 * 1024          # ~8 MiB per buffer
_VMEM_LIMIT = 48 * 1024 * 1024           # 2x(in+out) 8 MiB buffers = 32 MiB < 48


def _sigmoid_kernel(x_ref, o_ref):
    # Compute in f32 (mandatory on v5e: no bf16 VPU/EUP).
    xf = x_ref[...].astype(jnp.float32)
    # tanh-based logistic: exactly one EUP op per element; tanh saturates to
    # +/-1 for large |x| so the limits 0.0 / 1.0 are exact.
    y = 0.5 * jnp.tanh(0.5 * xf) + 0.5
    o_ref[...] = y.astype(o_ref.dtype)


def _compiler_params():
    return pltpu.CompilerParams(
        dimension_semantics=("parallel",),
        vmem_limit_bytes=_VMEM_LIMIT,
    )


def sigmoid_pallas(x):
    """Elementwise sigmoid, matching torch.nn.Sigmoid semantics."""
    orig_shape = x.shape
    dtype = x.dtype
    n = x.size

    if n == 0:
        return x

    itemsize = jnp.dtype(dtype).itemsize
    # Rows packed per sublane tile (f32: 8, bf16: 16, i8/fp8: 32).
    row_align = 8 * max(1, 4 // itemsize)

    # Prefer the widest lane dim (multiple of 128) that divides n exactly.
    lanes = None
    for cand in (2048, 1024, 512, 256, 128):
        if n % cand == 0:
            lanes = cand
            break

    if lanes is not None:
        # ---- Aligned fast path: lane-dense 2-D slab, no padding copies. ----
        rows = n // lanes
        x2d = x.reshape(rows, lanes)

        target_rows = max(row_align, _TARGET_BYTES // (lanes * itemsize))
        block_rows = max(row_align, (target_rows // row_align) * row_align)

        if block_rows >= rows:
            if rows > row_align:
                # Keep >= 2 grid steps for pipelining / 2-TC sharding instead
                # of collapsing to a single block.
                half = pl.cdiv(rows, 2)
                block_rows = max(row_align,
                                 pl.cdiv(half, row_align) * row_align)
            else:
                # Tiny tensor: one full-extent block (always legal).
                block_rows = rows

        grid = (pl.cdiv(rows, block_rows),)

        out2d = pl.pallas_call(
            _sigmoid_kernel,
            out_shape=jax.ShapeDtypeStruct((rows, lanes), dtype),
            grid_spec=pltpu.PrefetchScalarGridSpec(
                num_scalar_prefetch=0,
                grid=grid,
                in_specs=[pl.BlockSpec((block_rows, lanes), lambda i: (i, 0))],
                out_specs=pl.BlockSpec((block_rows, lanes), lambda i: (i, 0)),
            ),
            compiler_params=_compiler_params(),
        )(x2d)
        return out2d.reshape(orig_shape)

    # ---- Ragged path: 1-D stream with in-kernel masked partial block. ----
    # No jnp.pad / output slice -> exactly 1 HBM read + 1 HBM write.
    x1d = x.reshape(-1)
    chunk = row_align * 128  # minimal legal 1-D block granularity
    if n <= chunk:
        block = n            # full-extent block, legal for any size
        grid = (1,)
    else:
        block = max(chunk, (_TARGET_BYTES // itemsize // chunk) * chunk)
        if block >= n:
            # Keep >= 2 grid steps; Pallas masks the partial last block.
            block = max(chunk, pl.cdiv(pl.cdiv(n, 2), chunk) * chunk)
        grid = (pl.cdiv(n, block),)

    out1d = pl.pallas_call(
        _sigmoid_kernel,
        out_shape=jax.ShapeDtypeStruct((n,), dtype),
        grid_spec=pltpu.PrefetchScalarGridSpec(
            num_scalar_prefetch=0,
            grid=grid,
            in_specs=[pl.BlockSpec((block,), lambda i: (i,))],
            out_specs=pl.BlockSpec((block,), lambda i: (i,)),
        ),
        compiler_params=_compiler_params(),
    )(x1d)
    return out1d.reshape(orig_shape)


if __name__ == "__main__":
    key = jax.random.PRNGKey(0)
    # NCHW input consistent with a typical conv-style activation input.
    x = jax.random.normal(key, (2, 4, 16, 16), dtype=jnp.float32)

    y = sigmoid_pallas(x)
    y = jax.block_until_ready(y)

    # Sanity check against the pure-JAX reference (tanh-based sigmoid in the
    # kernel -> tolerance loosened to 1e-5 per review).
    y_ref = jax.nn.sigmoid(x)
    assert y.shape == x.shape and y.dtype == x.dtype
    assert jnp.allclose(y, y_ref, atol=1e-5, rtol=1e-5)

    # Also exercise the ragged (numel % 128 != 0) 1-D path.
    x_rag = jax.random.normal(jax.random.PRNGKey(1), (3, 7, 11), dtype=jnp.float32)
    y_rag = jax.block_until_ready(sigmoid_pallas(x_rag))
    assert jnp.allclose(y_rag, jax.nn.sigmoid(x_rag), atol=1e-5, rtol=1e-5)

    print("KERNEL_OK")
</pallas_src>

<mosaic_0001>
module attributes {stable_mosaic.version = 11 : i64} {
  func.func @_sigmoid_kernel(%arg0: i32, %arg1: memref<1x2048xf32, #tpu.memory_space<vmem>>, %arg2: memref<1x2048xf32, #tpu.memory_space<vmem>>) attributes {dimension_semantics = [#tpu.dimension_semantics<parallel>], iteration_bounds = array<i64: 1>, scalar_prefetch = 0 : i64, scratch_operands = 0 : i64, tpu.core_type = #tpu.core_type<tc>, window_params = [{transform_indices = @transform_0, window_bounds = array<i64: 1, 2048>}, {transform_indices = @transform_1, window_bounds = array<i64: 1, 2048>}]} {
    %c0 = arith.constant 0 : index
    %c0_0 = arith.constant 0 : index
    %0 = vector.load %arg1[%c0, %c0_0] : memref<1x2048xf32, #tpu.memory_space<vmem>>, vector<1x2048xf32>
    %cst = arith.constant 5.000000e-01 : f32
    %1 = vector.broadcast %cst : f32 to vector<1x2048xf32>
    %2 = arith.mulf %1, %0 : vector<1x2048xf32>
    %3 = math.tanh %2 : vector<1x2048xf32>
    %cst_1 = arith.constant 5.000000e-01 : f32
    %4 = vector.broadcast %cst_1 : f32 to vector<1x2048xf32>
    %5 = arith.mulf %4, %3 : vector<1x2048xf32>
    %cst_2 = arith.constant 5.000000e-01 : f32
    %6 = vector.broadcast %cst_2 : f32 to vector<1x2048xf32>
    %7 = arith.addf %5, %6 : vector<1x2048xf32>
    %c0_3 = arith.constant 0 : index
    %c0_4 = arith.constant 0 : index
    %8 = vector.load %arg2[%c0_3, %c0_4] : memref<1x2048xf32, #tpu.memory_space<vmem>>, vector<1x2048xf32>
    tpu.vector_store %arg2[%c0_3, %c0_4], %7 {strides = array<i32>} : memref<1x2048xf32, #tpu.memory_space<vmem>>, vector<1x2048xf32>,
    return
  }
  func.func @transform_0(%arg0: i32) -> (i32, i32) {
    %c0_i32 = arith.constant 0 : i32
    %c0_i32_0 = arith.constant 0 : i32
    return %arg0, %c0_i32 : i32, i32
  }
  func.func @transform_1(%arg0: i32) -> (i32, i32) {
    %c0_i32 = arith.constant 0 : i32
    %c0_i32_0 = arith.constant 0 : i32
    return %arg0, %c0_i32 : i32, i32
  }
}

</mosaic_0001>

<bundles_post_ra>
// kernel: tpu_custom_call.1
= control target key start
LH: loop header
LB: loop body
LE: loop exit
PB: predicated region body
PF: predicated region fallthrough
CT: control target
= control target key end

     0   :  { %6 = vsyncpa [#allocation3], 0  ;;  %s138_s0 = inlined_call_operand.hbm [shape: f32[1,2048], index: 0, kind: input, shape index: {}]   ;;  %s139_s1 = inlined_call_operand.hbm [shape: f32[1,2048], index: 1, kind: output, shape index: {}]  }
   0x1   :  { %7 = vsyncpa [#allocation4], 0  ;;  %s102_s6 = smov [#allocation2]   ;;  %s54_s10 = scalar_lea.hbm %s138_s0, 256 }
   0x2   :  { %s14_s7 = sshll.u32 %s102_s6, 4  ;;  %p55_p0 = scmp.ne.s32.totalorder %s138_s0, %s54_s10  ;;  %s15_s7 = int_to_ptr.vmem [resolvable:$true] %s14_s7 }
   0x3   :  { %p58_p1 = scmp.lt.u32.totalorder %s54_s10, %s138_s0 }
   0x5   :  { %p60_p2 = pnand %p58_p1, %p55_p0 }
   0x7   :  { %63 = shalt.err (!%p60_p2)
}
   0x8   :  { %s64_s15 = scalar_lea.vmem %s15_s7, 256  ;;  %p69_p4 = scmp.lt.s32.totalorder %s15_s7, %s15_s7 }
   0x9   :  { %p65_p3 = scmp.ne.s32.totalorder %s15_s7, %s64_s15  ;;  %p70_p5 = scmp.lt.s32.totalorder %s64_s15, %s64_s15 }
   0xb   :  { %p71_p6 = por %p70_p5, %p69_p4 }
   0xd   :  { %p72_p7 = pnand %p71_p6, %p65_p3 }
   0xf   :  { %75 = shalt.err (!%p72_p7)
}
  0x10   :  { %17 = dma.hbm_to_vmem [thread:$0]  %s138_s0, 256, %s15_s7, [#allocation3]  }
  0x11   :  { %98 = dma.done.wait [#allocation3], 256  }
  0x12   :  { %99 = vsyncadd [#allocation3], 4294967040  ;;  %v21_v0 = vld [vmem:[#allocation2] sm:$0xff]  ;;  %v22_v1 = vld [vmem:[#allocation2 + $0x8] sm:$0xff]  ;;  %s103_s18 = smov [#allocation5]  }
  0x13   :  { %v23_v2 = vmul.f32 0.5, %v21_v0  ;;  %v24_v3 = vmul.f32 0.5, %v22_v1  ;;  %s39_s19 = sshll.u32 %s103_s18, 4  ;;  %s40_s19 = int_to_ptr.vmem [resolvable:$true] %s39_s19 }
  0x14   :  { %s76_s0 = scalar_lea.vmem %s40_s19, 256  ;;  %p81_p9 = scmp.lt.s32.totalorder %s40_s19, %s40_s19 }
  0x15   :  { %50 = vtanh.f32 %v23_v2  ;;  %p77_p8 = scmp.ne.s32.totalorder %s40_s19, %s76_s0  ;;  %p82_p10 = scmp.lt.s32.totalorder %s76_s0, %s76_s0 }
  0x16   :  { %52 = vtanh.f32 %v24_v3 }
  0x17   :  { %p83_p11 = por %p82_p10, %p81_p9 }
  0x19   :  { %p84_p12 = pnand %p83_p11, %p77_p8 }
  0x1f   :  { %v51_v4 = vpop.eup %50 }
  0x20   :  { %v53_v5 = vpop.eup %52  ;;  %v27_v6 = vmul.f32 0.5, %v51_v4 }
  0x21   :  { %v28_v7 = vmul.f32 0.5, %v53_v5 }
  0x22   :  { %v29_v8 = vadd.f32 0.5, %v27_v6 }
  0x23   :  { %v30_v9 = vadd.f32 0.5, %v28_v7 }
  0x24   :  { %31 = vst [vmem:[#allocation5] sm:$0xff] %v29_v8 }
  0x25   :  { %32 = vst [vmem:[#allocation5 + $0x8] sm:$0xff] %v30_v9 }
  0x26   :  { %87 = shalt.err (!%p84_p12)
}
  0x27   :  { %s88_s22 = scalar_lea.hbm %s139_s1, 256 }
  0x28   :  { %p89_p13 = scmp.ne.s32.totalorder %s139_s1, %s88_s22  ;;  %p92_p0 = scmp.lt.u32.totalorder %s88_s22, %s139_s1 }
  0x2a   :  { %p94_p1 = pnand %p92_p0, %p89_p13 }
  0x2c   :  { %97 = shalt.err (!%p94_p1)
}
  0x2d   :  { %42 = dma.vmem_to_hbm [thread:$0]  %s40_s19, 256, %s139_s1, [#allocation4]  }
  0x2e   :  { %100 = dma.done.wait [#allocation4], 256  }
  0x2f   :  { %101 = vsyncadd [#allocation4], 4294967040 }
  0x30   :  { %46 = vsyncpa [#allocation3], 1 }
  0x31   :  { %47 = vsyncpa [#allocation4], 1 }

</bundles_post_ra>
